<compile_context>
chip_gen: v7x
topology: tpu7x:2x2x1
jax: 0.10.0
libtpu: 0.0.40
codegen_flags: <defaults>
</compile_context>

<pallas_src>
from functools import partial

import jax
import jax.numpy as jnp
from jax.experimental import pallas as pl
from jax.experimental.pallas import tpu as pltpu


# --------------------------------------------------------------------------
# Kernels
# --------------------------------------------------------------------------

def _tvd_sum_kernel(*refs, ignore_index, use_labels, BT, V, tm, tn,
                    need_row_mask, need_col_mask, single_col_block):
    """Fold 0.5*|p-q| of one (tm, tn) block into a lane-dense (tm, 128)
    partial sum held in the resident output block (accumulator across the
    vocab grid axis).  Streams the block in 128-lane groups so no full-tile
    f32 intermediate or scratch is materialized."""
    if use_labels:
        labels_ref, p_ref, q_ref, out_ref = refs
    else:
        p_ref, q_ref, out_ref = refs

    j = pl.program_id(1)

    # Per-row validity ((tm, 1)), computed once per grid step.  The edge masks
    # compile away entirely when BT / V tile evenly.
    row_ok = None
    if use_labels:
        row_ok = labels_ref[...] != ignore_index
    if need_row_mask:
        i = pl.program_id(0)
        in_rows = (jax.lax.broadcasted_iota(jnp.int32, (tm, 1), 0) + i * tm) < BT
        row_ok = in_rows if row_ok is None else jnp.logical_and(row_ok, in_rows)

    def group_tv(col0, width):
        """Masked 0.5*|p-q| for lanes [col0, col0+width) of this block."""
        pg = p_ref[:, col0:col0 + width].astype(jnp.float32)
        qg = q_ref[:, col0:col0 + width].astype(jnp.float32)
        t = 0.5 * jnp.abs(pg - qg)
        if row_ok is not None:
            t = jnp.where(row_ok, t, 0.0)
        if need_col_mask:
            col = (jax.lax.broadcasted_iota(jnp.int32, (1, width), 1)
                   + (j * tn + col0))
            t = jnp.where(col < V, t, 0.0)
        return t

    nfull = tn // 128
    rem = tn - nfull * 128

    if nfull:
        folded = group_tv(0, 128)
        for g in range(1, nfull):        # static loop, <= 64 groups (tn <= 8192)
            folded = folded + group_tv(g * 128, 128)
    else:
        folded = jnp.zeros((tm, 128), jnp.float32)
    if rem:
        # Ragged full-extent vocab block (tn == V, single vocab step):
        # XLU-reduce the tail and park it in lane 0 of the partial.
        tail = jnp.sum(group_tv(nfull * 128, rem), axis=-1, keepdims=True)
        lane0 = jax.lax.broadcasted_iota(jnp.int32, (tm, 128), 1) == 0
        folded = folded + jnp.where(lane0, tail, 0.0)

    if single_col_block:
        out_ref[...] = folded
    else:
        @pl.when(j == 0)
        def _():
            out_ref[...] = jnp.zeros_like(out_ref)
        out_ref[...] += folded           # (tm, 128) resident accumulator


def _tvd_none_kernel(*refs, ignore_index, use_labels):
    """Per-element 0.5*|p-q| with ignored rows zeroed (reduction='none')."""
    if use_labels:
        labels_ref, p_ref, q_ref, out_ref = refs
    else:
        p_ref, q_ref, out_ref = refs

    tv = 0.5 * jnp.abs(p_ref[...].astype(jnp.float32)
                       - q_ref[...].astype(jnp.float32))
    if use_labels:
        tv = jnp.where(labels_ref[...] != ignore_index, tv, 0.0)
    out_ref[...] = tv.astype(out_ref.dtype)


# --------------------------------------------------------------------------
# Tiling / hardware config
# --------------------------------------------------------------------------

_ROW_CAP = 8192     # caps the (tm, 128) lane-dense partial at 4 MiB
_LANE_CAP = 8192    # caps the static lane-group fold at 64 groups


def _hw_config():
    """(block_bytes, vmem_limit_bytes, dual_core) derived per generation."""
    vmem_cap = None
    try:
        vmem_cap = int(pltpu.get_tpu_info().vmem_capacity_bytes)
    except Exception:
        vmem_cap = None
    if vmem_cap is not None and vmem_cap > 96 * 1024 * 1024:
        # v5e / v6e class: 128 MiB physical VMEM, single TensorCore.
        return 8 * 1024 * 1024, 64 * 1024 * 1024, False
    # v7x class (64 MiB per TensorCore, two cores) or unknown: conservative.
    return 4 * 1024 * 1024, 48 * 1024 * 1024, True


def _choose_tiles(BT, V, block_bytes, split_rows):
    """Pick (tm, tn): full-extent blocks when they fit, otherwise multiples of
    (8, 128) with ragged edges handled by in-kernel masks."""
    block_elems = max(block_bytes // 4, 8 * 128)
    # Vocab (lane) axis: full-vocab rows when they fit with >= 8 rows.
    lane_cap = min(_LANE_CAP, max(128, ((block_elems // 8) // 128) * 128))
    tn = V if V <= lane_cap else lane_cap
    # Row (sublane) axis.
    rows_budget = min(_ROW_CAP, max(8, block_elems // max(tn, 1)))
    tm = BT if BT <= rows_budget else max(8, (rows_budget // 8) * 8)
    # Dual-TC chips: make sure the 'parallel' row axis has >= 2 blocks.
    if split_rows and BT >= 16 and pl.cdiv(BT, tm) < 2:
        tm = ((pl.cdiv(BT, 2) + 7) // 8) * 8
    return tm, tn


# --------------------------------------------------------------------------
# Wrapper
# --------------------------------------------------------------------------

def liger_tvd_loss(p, q, shift_labels=None, reduction="batchmean",
                   ignore_index=-100, *, block_bytes=None,
                   vmem_limit_bytes=None):
    """Forward pass of LigerTVDLoss."""
    BT, V = p.shape
    assert q.shape == (BT, V)
    use_labels = shift_labels is not None

    hw_block, hw_limit, dual_core = _hw_config()
    if block_bytes is None:
        block_bytes = hw_block
    if vmem_limit_bytes is None:
        vmem_limit_bytes = hw_limit

    if use_labels:
        labels = shift_labels.astype(jnp.int32)
        n_non_ignore = jnp.sum(labels != ignore_index).astype(jnp.float32)
        labels2d = labels.reshape(BT, 1)
    else:
        # Matches Liger: divide by the total number of rows when no labels.
        n_non_ignore = jnp.float32(BT)
        labels2d = None

    # ---------------- reduction == 'none' ----------------
    if reduction == "none":
        tm, tn = _choose_tiles(BT, V, block_bytes // 2, split_rows=False)
        grid = (pl.cdiv(BT, tm), pl.cdiv(V, tn))
        in_specs = [pl.BlockSpec((tm, tn), lambda i, j: (i, j)),
                    pl.BlockSpec((tm, tn), lambda i, j: (i, j))]
        args = [p, q]
        if use_labels:
            in_specs = [pl.BlockSpec((tm, 1), lambda i, j: (i, 0))] + in_specs
            args = [labels2d] + args
        return pl.pallas_call(
            partial(_tvd_none_kernel, ignore_index=ignore_index,
                    use_labels=use_labels),
            out_shape=jax.ShapeDtypeStruct((BT, V), p.dtype),
            grid_spec=pltpu.PrefetchScalarGridSpec(
                num_scalar_prefetch=0,
                grid=grid,
                in_specs=in_specs,
                out_specs=pl.BlockSpec((tm, tn), lambda i, j: (i, j)),
            ),
            compiler_params=pltpu.CompilerParams(
                dimension_semantics=("parallel", "parallel"),
                vmem_limit_bytes=vmem_limit_bytes),
        )(*args)

    if reduction not in ("batchmean", "sum", "mean"):
        raise ValueError(f"unsupported reduction: {reduction}")

    # ---------------- sum-style reductions ----------------
    tm, tn = _choose_tiles(BT, V, block_bytes, split_rows=dual_core)
    nrb = pl.cdiv(BT, tm)
    ncb = pl.cdiv(V, tn)
    need_row_mask = (BT % tm) != 0
    need_col_mask = (V % tn) != 0
    grid = (nrb, ncb)

    in_specs = [pl.BlockSpec((tm, tn), lambda i, j: (i, j)),
                pl.BlockSpec((tm, tn), lambda i, j: (i, j))]
    args = [p, q]
    if use_labels:
        in_specs = [pl.BlockSpec((tm, 1), lambda i, j: (i, 0))] + in_specs
        args = [labels2d] + args

    # Per-row-block lane-dense partials; the (tm, 128) output block is the
    # accumulator, resident across the 'arbitrary' vocab axis.  Row axis is
    # 'parallel' so dual-TC chips shard it across cores.
    partials = pl.pallas_call(
        partial(_tvd_sum_kernel, ignore_index=ignore_index,
                use_labels=use_labels, BT=BT, V=V, tm=tm, tn=tn,
                need_row_mask=need_row_mask, need_col_mask=need_col_mask,
                single_col_block=(ncb == 1)),
        out_shape=jax.ShapeDtypeStruct((nrb * tm, 128), jnp.float32),
        grid_spec=pltpu.PrefetchScalarGridSpec(
            num_scalar_prefetch=0,
            grid=grid,
            in_specs=in_specs,
            out_specs=pl.BlockSpec((tm, 128), lambda i, j: (i, 0)),
        ),
        compiler_params=pltpu.CompilerParams(
            dimension_semantics=("parallel", "arbitrary"),
            vmem_limit_bytes=vmem_limit_bytes),
    )(*args)

    total = jnp.sum(partials)

    if reduction == "batchmean":
        # Note: all-rows-ignored -> division by zero (inf/nan), same as Liger.
        return total / n_non_ignore
    elif reduction == "sum":
        return total
    else:  # "mean"
        return total / (n_non_ignore * jnp.float32(V))


# --------------------------------------------------------------------------
# Reference + self-test
# --------------------------------------------------------------------------

def _reference_tvd(p, q, shift_labels, reduction, ignore_index):
    BT, V = p.shape
    tv = 0.5 * jnp.abs(p.astype(jnp.float32) - q.astype(jnp.float32))
    if shift_labels is None:
        n_non_ignore = jnp.float32(BT)
    else:
        mask = (shift_labels != ignore_index)[:, None]
        tv = jnp.where(mask, tv, 0.0)
        n_non_ignore = jnp.sum(shift_labels != ignore_index).astype(jnp.float32)
    if reduction == "batchmean":
        return jnp.sum(tv) / n_non_ignore
    if reduction == "sum":
        return jnp.sum(tv)
    if reduction == "mean":
        return jnp.sum(tv) / (n_non_ignore * V)
    return tv.astype(p.dtype)


if __name__ == "__main__":
    # Small shapes: batch=2, seq=8 -> BT=16 rows; vocab V=256.
    batch, seq, vocab = 2, 8, 256
    BT = batch * seq
    ignore_index = -100

    key = jax.random.PRNGKey(0)
    kp, kq, kl = jax.random.split(key, 3)
    p = jax.nn.softmax(jax.random.normal(kp, (BT, vocab), jnp.float32), axis=-1)
    q = jax.nn.softmax(jax.random.normal(kq, (BT, vocab), jnp.float32), axis=-1)
    shift_labels = jax.random.randint(kl, (BT,), 0, vocab, dtype=jnp.int32)
    shift_labels = shift_labels.at[0].set(ignore_index)
    shift_labels = shift_labels.at[5].set(ignore_index)

    # 1) Default forward: reduction='batchmean', with shift_labels.
    loss = jax.block_until_ready(
        liger_tvd_loss(p, q, shift_labels, "batchmean", ignore_index))
    ref = _reference_tvd(p, q, shift_labels, "batchmean", ignore_index)
    assert jnp.allclose(loss, ref, rtol=1e-5, atol=1e-6), (loss, ref)

    # 2) No-label path, reduction='sum'.
    loss2 = jax.block_until_ready(liger_tvd_loss(p, q, None, "sum", ignore_index))
    ref2 = _reference_tvd(p, q, None, "sum", ignore_index)
    assert jnp.allclose(loss2, ref2, rtol=1e-5, atol=1e-6), (loss2, ref2)

    # 3) Elementwise path (reduction='none'), dtype preserved.
    loss3 = jax.block_until_ready(
        liger_tvd_loss(p, q, shift_labels, "none", ignore_index))
    ref3 = _reference_tvd(p, q, shift_labels, "none", ignore_index)
    assert loss3.dtype == p.dtype
    assert jnp.allclose(loss3, ref3, rtol=1e-5, atol=1e-6)

    # 4) Ragged shapes + forced tiny blocks: exercises multi-block vocab
    #    accumulation, edge row/col masks, and out-of-bounds block padding.
    BT2, V2 = 20, 200
    kp2, kq2, kl2 = jax.random.split(jax.random.PRNGKey(1), 3)
    p2 = jax.nn.softmax(jax.random.normal(kp2, (BT2, V2), jnp.float32), axis=-1)
    q2 = jax.nn.softmax(jax.random.normal(kq2, (BT2, V2), jnp.float32), axis=-1)
    lab2 = jax.random.randint(kl2, (BT2,), 0, V2, dtype=jnp.int32)
    lab2 = lab2.at[3].set(ignore_index)

    loss4 = jax.block_until_ready(
        liger_tvd_loss(p2, q2, lab2, "batchmean", ignore_index, block_bytes=4096))
    ref4 = _reference_tvd(p2, q2, lab2, "batchmean", ignore_index)
    assert jnp.allclose(loss4, ref4, rtol=1e-5, atol=1e-6), (loss4, ref4)

    # 5) 'none' with ragged shapes + tiny blocks: OOB output writes discarded.
    loss5 = jax.block_until_ready(
        liger_tvd_loss(p2, q2, lab2, "none", ignore_index, block_bytes=8192))
    ref5 = _reference_tvd(p2, q2, lab2, "none", ignore_index)
    assert jnp.allclose(loss5, ref5, rtol=1e-5, atol=1e-6)

    # 6) Ragged full-extent vocab (tn == V, V % 128 != 0) on default tiles.
    loss6 = jax.block_until_ready(
        liger_tvd_loss(p2, q2, lab2, "mean", ignore_index))
    ref6 = _reference_tvd(p2, q2, lab2, "mean", ignore_index)
    assert jnp.allclose(loss6, ref6, rtol=1e-5, atol=1e-6), (loss6, ref6)

    print("KERNEL_OK")
</pallas_src>

<mosaic_0001>
module attributes {stable_mosaic.version = 11 : i64} {
  func.func @_tvd_sum_kernel(%arg0: i32, %arg1: i32, %arg2: memref<8x1xi32, #tpu.memory_space<vmem>>, %arg3: memref<8x256xf32, #tpu.memory_space<vmem>>, %arg4: memref<8x256xf32, #tpu.memory_space<vmem>>, %arg5: memref<8x128xf32, #tpu.memory_space<vmem>>) attributes {dimension_semantics = [#tpu.dimension_semantics<parallel>, #tpu.dimension_semantics<arbitrary>], iteration_bounds = array<i64: 2, 1>, scalar_prefetch = 0 : i64, scratch_operands = 0 : i64, tpu.core_type = #tpu.core_type<tc>, window_params = [{transform_indices = @transform_0, window_bounds = array<i64: 8, 1>}, {transform_indices = @transform_1, window_bounds = array<i64: 8, 256>}, {transform_indices = @transform_2, window_bounds = array<i64: 8, 256>}, {transform_indices = @transform_3, window_bounds = array<i64: 8, 128>}]} {
    %c0 = arith.constant 0 : index
    %c0_0 = arith.constant 0 : index
    %0 = vector.load %arg2[%c0, %c0_0] : memref<8x1xi32, #tpu.memory_space<vmem>>, vector<8x1xi32>
    %c-100_i32 = arith.constant -100 : i32
    %1 = vector.broadcast %c-100_i32 : i32 to vector<8x1xi32>
    %2 = arith.cmpi ne, %0, %1 : vector<8x1xi32>
    %c0_1 = arith.constant 0 : index
    %c0_2 = arith.constant 0 : index
    %3 = vector.load %arg3[%c0_1, %c0_2] : memref<8x256xf32, #tpu.memory_space<vmem>>, vector<8x128xf32>
    %c0_3 = arith.constant 0 : index
    %c0_4 = arith.constant 0 : index
    %4 = vector.load %arg4[%c0_3, %c0_4] : memref<8x256xf32, #tpu.memory_space<vmem>>, vector<8x128xf32>
    %5 = arith.subf %3, %4 : vector<8x128xf32>
    %6 = math.absf %5 : vector<8x128xf32>
    %cst = arith.constant 5.000000e-01 : f32
    %7 = vector.broadcast %cst : f32 to vector<8x128xf32>
    %8 = arith.mulf %7, %6 : vector<8x128xf32>
    %cst_5 = arith.constant 0.000000e+00 : f32
    %9 = vector.shape_cast %2 : vector<8x1xi1> to vector<8x1xi1>
    %10 = vector.broadcast %9 : vector<8x1xi1> to vector<8x128xi1>
    %11 = vector.broadcast %cst_5 : f32 to vector<8x128xf32>
    %12 = arith.select %10, %8, %11 : vector<8x128xi1>, vector<8x128xf32>
    %c0_6 = arith.constant 0 : index
    %c128 = arith.constant 128 : index
    %13 = vector.load %arg3[%c0_6, %c128] : memref<8x256xf32, #tpu.memory_space<vmem>>, vector<8x128xf32>
    %c0_7 = arith.constant 0 : index
    %c128_8 = arith.constant 128 : index
    %14 = vector.load %arg4[%c0_7, %c128_8] : memref<8x256xf32, #tpu.memory_space<vmem>>, vector<8x128xf32>
    %15 = arith.subf %13, %14 : vector<8x128xf32>
    %16 = math.absf %15 : vector<8x128xf32>
    %cst_9 = arith.constant 5.000000e-01 : f32
    %17 = vector.broadcast %cst_9 : f32 to vector<8x128xf32>
    %18 = arith.mulf %17, %16 : vector<8x128xf32>
    %cst_10 = arith.constant 0.000000e+00 : f32
    %19 = vector.shape_cast %2 : vector<8x1xi1> to vector<8x1xi1>
    %20 = vector.broadcast %19 : vector<8x1xi1> to vector<8x128xi1>
    %21 = vector.broadcast %cst_10 : f32 to vector<8x128xf32>
    %22 = arith.select %20, %18, %21 : vector<8x128xi1>, vector<8x128xf32>
    %23 = arith.addf %12, %22 : vector<8x128xf32>
    %c0_11 = arith.constant 0 : index
    %c0_12 = arith.constant 0 : index
    %24 = vector.load %arg5[%c0_11, %c0_12] : memref<8x128xf32, #tpu.memory_space<vmem>>, vector<8x128xf32>
    tpu.vector_store %arg5[%c0_11, %c0_12], %23 {strides = array<i32>} : memref<8x128xf32, #tpu.memory_space<vmem>>, vector<8x128xf32>,
    return
  }
  func.func @transform_0(%arg0: i32, %arg1: i32) -> (i32, i32) {
    %c0_i32 = arith.constant 0 : i32
    %c0_i32_0 = arith.constant 0 : i32
    return %arg0, %c0_i32 : i32, i32
  }
  func.func @transform_1(%arg0: i32, %arg1: i32) -> (i32, i32) {
    %c0_i32 = arith.constant 0 : i32
    return %arg0, %arg1 : i32, i32
  }
  func.func @transform_2(%arg0: i32, %arg1: i32) -> (i32, i32) {
    %c0_i32 = arith.constant 0 : i32
    return %arg0, %arg1 : i32, i32
  }
  func.func @transform_3(%arg0: i32, %arg1: i32) -> (i32, i32) {
    %c0_i32 = arith.constant 0 : i32
    %c0_i32_0 = arith.constant 0 : i32
    return %arg0, %c0_i32 : i32, i32
  }
}

</mosaic_0001>

<bundles_post_ra>
// kernel: tpu_custom_call.1
= control target key start
LH: loop header
LB: loop body
LE: loop exit
PB: predicated region body
PF: predicated region fallthrough
CT: control target
= control target key end

     0   :  { %8 = vsyncpa [#allocation3], 0  ;;  %s903_s0 = inlined_call_operand.vmem [shape: s32[16,1], index: 0, kind: input, shape index: {}]   ;;  %s904_s1 = inlined_call_operand.hbm [shape: f32[16,256], index: 1, kind: input, shape index: {}]   ;;  %s905_s2 = inlined_call_operand.hbm [shape: f32[16,256], index: 2, kind: input, shape index: {}]   ;;  %s906_s3 = inlined_call_operand.hbm [shape: f32[16,128], index: 3, kind: output, shape index: {}]  }
   0x1   :  { %10 = vsyncpa [#allocation3 + $0x1], 0 }
   0x2   :  { %11 = vsyncpa [#allocation6], 0 }
   0x3   :  { %13 = vsyncpa [#allocation6 + $0x1], 0 }
   0x4   :  { %14 = vsyncpa [#allocation4], 0 }
   0x5   :  { %16 = vsyncpa [#allocation4 + $0x1], 0  ;;  %s677_s12 = smov 0   ;;  %s679_s13 = smov 0  }
   0x6   :  { %s681_s14 = smov 0   ;;  %s683_s15 = smov 0  }
   0x7   :  { %s685_s16 = smov 0   ;;  %s687_s17 = smov 0  }
   0x8 LB: > { %s415_s18 = sadd.s32 4294967295, %s651_s17   ;;  %s416_s19 = sadd.s32 4294967294, %s651_s17   ;;  %s651_s17 = sphi %s687_s17, %s22_s17   ;;  %s647_s16 = sphi %s685_s16, %s926_s16   ;;  %s643_s15 = sphi %s683_s15, %s925_s15   ;;  %s639_s14 = sphi %s681_s14, %s924_s14   ;;  %s635_s13 = sphi %s679_s13, %s923_s13   ;;  %s631_s12 = sphi %s677_s12, %s922_s12  }
   0x9   : > { %s34_s20 = sadd.s32 1, %s647_s16  ;;  %s69_s21 = sadd.s32 1, %s639_s14 }
   0xa   : > { %p36_p0 = scmp.ge.s32.totalorder %s34_s20, 2  ;;  %p76_p1 = scmp.ne.s32.totalorder %s639_s14, %s635_s13 }
   0xb   : > { %p77_p2 = scmp.eq.s32.totalorder %s651_s17, 0  ;;  %p82_p3 = scmp.ne.s32.totalorder %s635_s13, %s631_s12 }
   0xc   : > { %s928_s20 = smov (%p36_p0, %s34_s20), 0  ;;  %p83_p5 = scmp.eq.s32.totalorder %s415_s18, 0 }
   0xd   : > { %p718_p4 = por %p77_p2, %p76_p1  ;;  %s64_s23 = ssub.s32 %s647_s16, %s928_s20 }
   0xe   : > { %p134_p6 = scmp.eq.s32.totalorder %s415_s18, 1  ;;  %p67_p7 = scmp.eq.s32.totalorder %s64_s23, 0 }
   0xf   : > { %p724_p8 = por %p83_p5, %p82_p3  ;;  %p140_p10 = scmp.eq.s32.totalorder %s416_s19, 1 }
  0x10   : > { %p728_p9 = por %p134_p6, %p76_p1  ;;  %p453_p13 = scmp.lt.s32.totalorder %s651_s17, 2 }
  0x11   : > { %s910_s24 = scalar_select %p724_p8, 1, 0 }
  0x12   : > { %s911_s25 = scalar_select %p728_p9, 1, 0 }
  0x13   : > { %s733_s26 = scalar_select %p67_p7, %s639_s14, %s69_s21  }
  0x14   : > { %p735_p11 = por %p140_p10, %p82_p3  ;;  %s742_s28 = sand.u32 1, %s639_s14  }
  0x15   : > { %s419_s29 = sshll.u32 %s742_s28, 4  ;;  %s434_s30 = sshll.u32 %s647_s16, 8 }
  0x16   : > { %s912_s27 = scalar_select %p735_p11, 1, 0 }
  0x17   : > { %s751_s6 = scalar_lea.hbm %s904_s1, %s434_s30  ;;  %s171_s7 = scalar_lea.vmem [#allocation2], %s419_s29 }
  0x18   : > { %s181_s8 = sshll.u32 %s171_s7, 4  ;;  %p759_p0 = pnand %p453_p13, %p718_p4  ;;  %s755_s8 = int_to_ptr.vmem [resolvable:$true] %s181_s8 }
  0x19   : > { %s168_s10 = scalar_lea.sflag [#allocation3], %s742_s28  ;;  %s505_s11 = scalar_lea.hbm %s751_s6, 256 }
  0x1a   : > { %p506_p3 = scmp.ne.s32.totalorder %s751_s6, %s505_s11  ;;  %p507_p5 = pneg %p759_p0 }
  0x1b   : > { %s510_s21 = scalar_lea.hbm %s904_s1, 512  ;;  %p511_p4 = scmp.lt.u32.totalorder %s751_s6, %s904_s1 }
  0x1c   : > { %p508_p6 = pnand %p507_p5, %p506_p3  ;;  %p512_p10 = scmp.lt.u32.totalorder %s510_s21, %s505_s11 }
  0x1d   : > { %p514_p12 = scmp.lt.u32.totalorder %s505_s11, %s751_s6 }
  0x1e   : > { %p509_p7 = pneg %p508_p6  ;;  %p513_p13 = por %p512_p10, %p511_p4 }
  0x20   : > { %p515_p1 = por %p514_p12, %p513_p13 }
  0x22   : > { %p516_p2 = pnand %p515_p1, %p509_p7 }
  0x24   : > { %519 = shalt.err (!%p516_p2)
}
  0x25   : > { %s520_s4 = scalar_lea.vmem %s755_s8, 256  ;;  %s653_s5 = smov [#allocation2]  }
  0x26   : > { %p521_p3 = scmp.ne.s32.totalorder %s755_s8, %s520_s4  ;;  %s525_s7 = sshll.u32 %s653_s5, 4  ;;  %s526_s7 = int_to_ptr.vmem [resolvable:$false] %s525_s7 }
  0x27   : > { %s527_s18 = scalar_lea.vmem %s526_s7, 512  ;;  %p528_p9 = scmp.lt.s32.totalorder %s755_s8, %s526_s7 }
  0x28   : > { %p523_p6 = pnand %p521_p3, %p507_p5  ;;  %p529_p4 = scmp.lt.s32.totalorder %s527_s18, %s520_s4 }
  0x2a   : > { %p524_p11 = pneg %p523_p6  ;;  %p530_p10 = por %p529_p4, %p528_p9 }
  0x2c   : > { %p531_p12 = pnand %p530_p10, %p524_p11 }
  0x2e   : > { %534 = shalt.err (!%p531_p12)
}
  0x2f   : > { %445 = dma.hbm_to_vmem [thread:$0]  (!%p759_p0), %s751_s6, 256, %s755_s8, %s168_s10  }
  0x30   : > { %p914_p1 = scmp.lt.s32.totalorder %s651_s17, 3  ;;  %p915_p2 = scmp.ge.s32.totalorder %s651_s17, 1 }
  0x31   : > { %s804_s22 = scalar_lea.hbm %s905_s2, %s434_s30  ;;  %s192_s23 = scalar_lea.vmem [#allocation5], %s419_s29 }
  0x32   : > { %p795_p7 = pnand %p915_p2, %p914_p1  ;;  %s202_s4 = sshll.u32 %s192_s23, 4  ;;  %s203_s4 = int_to_ptr.vmem [resolvable:$true] %s202_s4 }
  0x33   : > { %s189_s6 = scalar_lea.sflag [#allocation6], %s742_s28  ;;  %s535_s8 = scalar_lea.hbm %s804_s22, 256 }
  0x34   : > { %s916_s11 = scalar_select %p795_p7, 1, 0 }
  0x35   : > { %p536_p9 = scmp.ne.s32.totalorder %s804_s22, %s535_s8  ;;  %s540_s30 = scalar_lea.hbm %s905_s2, 512 }
  0x36   : > { %p541_p3 = scmp.lt.u32.totalorder %s804_s22, %s905_s2  ;;  %p542_p6 = scmp.lt.u32.totalorder %s540_s30, %s535_s8 }
  0x37   : > { %p538_p11 = pnand %p536_p9, %p507_p5  ;;  %p544_p10 = scmp.lt.u32.totalorder %s535_s8, %s804_s22 }
  0x38   : > { %p543_p4 = por %p542_p6, %p541_p3 }
  0x39   : > { %p539_p13 = pneg %p538_p11 }
  0x3a   : > { %p545_p12 = por %p544_p10, %p543_p4 }
  0x3c   : > { %p546_p1 = pnand %p545_p12, %p539_p13 }
  0x3e   : > { %549 = shalt.err (!%p546_p1)
}
  0x3f   : > { %s550_s28 = scalar_lea.vmem %s203_s4, 256  ;;  %s654_s29 = smov [#allocation5]  }
  0x40   : > { %p551_p2 = scmp.ne.s32.totalorder %s203_s4, %s550_s28  ;;  %s555_s19 = sshll.u32 %s654_s29, 4  ;;  %s556_s19 = int_to_ptr.vmem [resolvable:$false] %s555_s19 }
  0x41   : > { %s557_s21 = scalar_lea.vmem %s556_s19, 512  ;;  %p558_p8 = scmp.lt.s32.totalorder %s203_s4, %s556_s19 }
  0x42   : > { %p553_p9 = pnand %p551_p2, %p507_p5  ;;  %p559_p7 = scmp.lt.s32.totalorder %s557_s21, %s550_s28 }
  0x44   : > { %p554_p11 = pneg %p553_p9  ;;  %p560_p3 = por %p559_p7, %p558_p8 }
  0x46   : > { %p561_p6 = pnand %p560_p3, %p554_p11 }
  0x48   : > { %564 = shalt.err (!%p561_p6)
}
  0x49   : > { %448 = dma.hbm_to_vmem [thread:$0]  (!%p759_p0), %s804_s22, 256, %s203_s4, %s189_s6  }
  0x4a   : > { %p917_p13 = scmp.ne.s32.totalorder %s916_s11, 0 }
  0x4b   : > { %s831_s23 = sand.u32 (!%p917_p13), 1, %s635_s13   ;;  %p918_p5 = scmp.ne.s32.totalorder (!%p917_p13), %s910_s24, 0 }
  0x4c   : > { %211 = sbr.rel (%p917_p13) target bundleno = 241 (0xf1), region = 32  ;;  %s426_s8 = sshll.u32 (!%p917_p13), %s831_s23, 4 }
  0x4d   : > { %s214_s10 = scalar_lea.sflag (!%p917_p13), [#allocation3], %s831_s23  ;;  %s217_s5 = scalar_lea.vmem (!%p917_p13), [#allocation2], %s426_s8 }
  0x53   : > { %618 = dma.done.wait (%p918_p5), %s214_s10, 256  }
  0x54   : > { %620 = vsyncadd (%p918_p5), %s214_s10, 4294967040  ;;  %s223_s9 = scalar_lea.sflag [#allocation6], %s831_s23  ;;  %s226_s22 = scalar_lea.vmem [#allocation5], %s426_s8 }
  0x55   : > { %622 = dma.done.wait (%p918_p5), %s223_s9, 256  }
  0x56   : > { %624 = vsyncadd (%p918_p5), %s223_s9, 4294967040  ;;  %p258_p8 = scmp.lt.s32.totalorder %s643_s15, 1  ;;  %v655_v0 = vmov 0   ;;  %v266_v3 = vld [vmem:[%s217_s5] sm:$0xff]  ;;  %v277_v5 = vld [vmem:[%s217_s5 + $0x8] sm:$0xff]  ;;  %s428_s24 = sshll.u32 %s831_s23, 3 }
  0x57   : > { %504 = vset.pattern.permute.xlu0 %v655_v0  ;;  %v267_v4 = vld [vmem:[%s226_s22] sm:$0xff]  ;;  %v278_v6 = vld [vmem:[%s226_s22 + $0x8] sm:$0xff]  ;;  %s431_s18 = sshll.u32 %s643_s15, 7  ;;  %s257_s28 = scalar_lea.vmem [#allocation7], %s428_s24 }
  0x58   : > { %s259_s11 = scalar_select %p258_p8, %s643_s15, 1  ;;  %v268_v7 = vsub.f32 %v266_v3, %v267_v4  ;;  %v279_v8 = vsub.f32 %v277_v5, %v278_v6 }
  0x59   : > { %s299_s29 = sshll.u32 %s257_s28, 4  ;;  %s854_s8 = scalar_lea.hbm %s906_s3, %s431_s18  ;;  %s856_s29 = int_to_ptr.vmem [resolvable:$true] %s299_s29 }
  0x5a   : > { %s429_s4 = sshll.u32 %s259_s11, 3  ;;  %v269_v9 = vand.u32 2147483647, %v268_v7  ;;  %v280_v10 = vand.u32 2147483647, %v279_v8  ;;  %s286_s10 = scalar_lea.sflag [#allocation4], %s831_s23 }
  0x5b   : > { %s261_s7 = scalar_lea.vmem %s903_s0, %s429_s4  ;;  %s565_s5 = scalar_lea.vmem %s856_s29, 128 }
  0x5c   : > { %v264_v1 = vld [vmem:[%s261_s7] sm:$0xff]  ;;  %v270_v11 = vmul.f32 0.5, %v269_v9  ;;  %v281_v12 = vmul.f32 0.5, %v280_v10  ;;  %p566_p0 = scmp.ne.s32.totalorder %s856_s29, %s565_s5  ;;  %p919_p7 = scmp.ne.s32.totalorder %s911_s25, 0 }
  0x5d   : > { %vm265_vm0 = vcmp.ne.s32.totalorder %v264_v1, 4294967196  ;;  %s656_s15 = smov [#allocation7]  }
  0x5e   : > { %v271_v2 = vsel %vm265_vm0, 1, %v655_v0  ;;  %p567_p4 = pnand %p566_p0, %p919_p7  ;;  %s569_s9 = sshll.u32 %s656_s15, 4  ;;  %s570_s9 = int_to_ptr.vmem [resolvable:$false] %s569_s9 }
  0x5f   : > { %273 = vperm.xlu0 %504, %v271_v2   ;;  %s571_s22 = scalar_lea.vmem %s570_s9, 256  ;;  %p572_p12 = scmp.lt.s32.totalorder %s856_s29, %s570_s9 }
  0x60   : > { %p568_p10 = pneg %p567_p4  ;;  %p573_p1 = scmp.lt.s32.totalorder %s571_s22, %s565_s5 }
  0x62   : > { %p574_p2 = por %p573_p1, %p572_p12 }
  0x64   : > { %p575_p9 = pnand %p574_p2, %p568_p10 }
  0xde   : > { %v274_v13 = vpop.permute.xlu0 %273 }
  0xdf   : > { %vm275_vm1 = vcmp.eq.s32.totalorder %v274_v13, 1 }
  0xe0   : > { %v276_v14 = vsel %vm275_vm1, %v270_v11, 0.0  ;;  %v282_v15 = vsel %vm275_vm1, %v281_v12, 0.0 }
  0xe1   : > { %v283_v16 = vadd.f32 %v282_v15, %v276_v14 }
  0xe3   : > { %284 = vst [vmem:[%s257_s28] sm:$0xff] %v283_v16 }
  0xe4   : > { %578 = shalt.err (!%p575_p9)
}
  0xe5   : > { %s579_s23 = scalar_lea.hbm %s854_s8, 128  ;;  %s583_s6 = scalar_lea.hbm %s906_s3, 256 }
  0xe6   : > { %p580_p11 = scmp.ne.s32.totalorder %s854_s8, %s579_s23  ;;  %p584_p13 = scmp.lt.u32.totalorder %s854_s8, %s906_s3 }
  0xe7   : > { %p585_p5 = scmp.lt.u32.totalorder %s583_s6, %s579_s23  ;;  %p587_p0 = scmp.lt.u32.totalorder %s579_s23, %s854_s8 }
  0xe8   : > { %p581_p3 = pnand %p580_p11, %p919_p7 }
  0xe9   : > { %p586_p8 = por %p585_p5, %p584_p13 }
  0xea   : > { %p582_p6 = pneg %p581_p3 }
  0xeb   : > { %p588_p4 = por %p587_p0, %p586_p8 }
  0xed   : > { %p589_p10 = pnand %p588_p4, %p582_p6 }
  0xef   : > { %592 = shalt.err (!%p589_p10)
}
  0xf0   : > { %440 = dma.vmem_to_hbm [thread:$0]  (%p919_p7), %s856_s29, 128, %s854_s8, %s286_s10  }
  0xf1 PF: > { %s311_s24 = sand.u32 1, %s631_s12   ;;  %p920_p12 = scmp.ne.s32.totalorder %s912_s27, 0 }
  0xf2   : > { %p921_p1 = scmp.ge.s32.totalorder %s651_s17, 2  ;;  %s312_s18 = scalar_lea.sflag [#allocation4], %s311_s24 }
  0xf4   : > { %p450_p2 = pnand %p921_p1, %p920_p12 }
  0xf6   : > { %626 = dma.done.wait (!%p450_p2), %s312_s18, 128  }
  0xf7   : > { %628 = vsyncadd (!%p450_p2), %s312_s18, 4294967168  ;;  %s22_s17 = sadd.s32 1, %s651_s17   ;;  %s922_s12 = smov %s635_s13 }
  0xf8   : > { %p19_p9 = scmp.ge.s32.totalorder %s22_s17, 4   ;;  %s923_s13 = smov %s639_s14 }
  0xf9   : > { %s924_s14 = smov %s733_s26  ;;  %s925_s15 = smov %s647_s16 }
  0xfa   : > { %s926_s16 = smov %s928_s20  ;;  %21 = sbr.rel (!%p19_p9) target bundleno = 8 (0x8), region = 93 }
 0x101   :  { %317 = vsyncpa [#allocation3], 1 }
 0x102   :  { %319 = vsyncpa [#allocation3 + $0x1], 1 }
 0x103   :  { %320 = vsyncpa [#allocation6], 1 }
 0x104   :  { %322 = vsyncpa [#allocation6 + $0x1], 1 }
 0x105   :  { %323 = vsyncpa [#allocation4], 1 }
 0x106   :  { %325 = vsyncpa [#allocation4 + $0x1], 1 }

</bundles_post_ra>
